<compile_context>
chip_gen: v5e
topology: v5e:2x2
jax: 0.10.0
libtpu: 0.0.40
codegen_flags: <defaults>
</compile_context>

<pallas_src>
import functools

import jax
import jax.numpy as jnp
from jax.experimental import pallas as pl
from jax.experimental.pallas import tpu as pltpu


def _round_up(a: int, b: int) -> int:
    return (a + b - 1) // b * b


def gate_kernel(x_ref, w1_ref, b1_ref, w2_ref, b2_ref, o_ref, acc_ref):
    k = pl.program_id(1)

    @pl.when(k == 0)
    def _():
        acc_ref[...] = jnp.zeros_like(acc_ref)

    # gate1 H-chunk: (tm, D) @ (D, th) + b1 -> ReLU
    h = jnp.dot(x_ref[...], w1_ref[...], preferred_element_type=jnp.float32)
    h = jnp.maximum(h + b1_ref[...], 0.0)
    # TODO(synk): F.dropout is only active in training mode; inference-mode
    # forward (identity) is implemented here.

    # gate2 partial product, accumulated over H chunks in f32 scratch
    acc_ref[...] += jnp.dot(h.astype(w2_ref.dtype), w2_ref[...],
                            preferred_element_type=jnp.float32)

    @pl.when(k == pl.num_programs(1) - 1)
    def _():
        y = acc_ref[...] + b2_ref[...]
        o_ref[...] = jax.nn.sigmoid(y).astype(o_ref.dtype)


@functools.partial(jax.jit, static_argnames=("tm", "th"))
def gate_forward(x2d, w1, b1, w2, b2, tm=256, th=512):
    M, D = x2d.shape
    H = w1.shape[1]
    O = w2.shape[1]
    dtype = x2d.dtype
    itemsize = jnp.dtype(dtype).itemsize

    # Effective tile sizes (respect the (8,128) tiling constraint, shrink for tiny problems)
    tm_eff = min(tm, _round_up(M, 8))
    th_eff = min(th, _round_up(H, 128))

    M_pad = _round_up(M, tm_eff)              # no rows silently dropped
    H_pad = _round_up(H, th_eff)              # zero-padded H contributes 0
    O_pad = _round_up(max(O, 128), 128)       # lane-dense output slab

    # Zero-pad operands: padded H columns/rows contribute nothing, padded
    # M rows and O columns are sliced off below.
    x_p = jnp.zeros((M_pad, D), dtype).at[:M, :].set(x2d)
    w1_p = jnp.zeros((D, H_pad), w1.dtype).at[:, :H].set(w1)
    b1_p = jnp.zeros((1, H_pad), b1.dtype).at[0, :H].set(b1)
    w2_p = jnp.zeros((H_pad, O_pad), w2.dtype).at[:H, :O].set(w2)
    b2_p = jnp.zeros((1, O_pad), b2.dtype).at[0, :O].set(b2)

    grid = (M_pad // tm_eff, H_pad // th_eff)

    # Explicit VMEM budget: double-buffered inputs/outputs + f32 accumulator.
    vmem_bytes = int(
        (2 * tm_eff * D
         + 2 * D * th_eff
         + 2 * th_eff
         + 2 * th_eff * O_pad
         + 2 * O_pad
         + 2 * tm_eff * O_pad) * itemsize
        + tm_eff * O_pad * 4)
    vmem_limit = max(32 * 1024 * 1024,
                     min(64 * 1024 * 1024, 2 * vmem_bytes + (4 << 20)))

    cost = pl.CostEstimate(
        flops=2 * M * (D * H + H * O),
        transcendentals=M * O,
        bytes_accessed=int((M * D + D * H + H + H * O + O + M * O) * itemsize),
    )

    out = pl.pallas_call(
        gate_kernel,
        out_shape=jax.ShapeDtypeStruct((M_pad, O_pad), dtype),
        grid_spec=pltpu.PrefetchScalarGridSpec(
            num_scalar_prefetch=0,
            grid=grid,
            in_specs=[
                pl.BlockSpec((tm_eff, D), lambda i, k: (i, 0)),       # x row tile
                pl.BlockSpec((D, th_eff), lambda i, k: (0, k)),       # W1 H-chunk
                pl.BlockSpec((1, th_eff), lambda i, k: (0, k)),       # b1 H-chunk
                pl.BlockSpec((th_eff, O_pad), lambda i, k: (k, 0)),   # W2 H-chunk
                pl.BlockSpec((1, O_pad), lambda i, k: (0, 0)),        # b2
            ],
            out_specs=pl.BlockSpec((tm_eff, O_pad), lambda i, k: (i, 0)),
            scratch_shapes=[pltpu.VMEM((tm_eff, O_pad), jnp.float32)],
        ),
        compiler_params=pltpu.CompilerParams(
            dimension_semantics=("parallel", "arbitrary"),
            vmem_limit_bytes=vmem_limit),
        cost_estimate=cost,
    )(x_p, w1_p, b1_p, w2_p, b2_p)

    return out[:M, :O]


def init_gate_params(key, dimension, scalar, biased_gates, gate_bias,
                     dtype=jnp.float32):
    """Deterministic synthetic init mirroring nn.Linear shapes."""
    out_dim = 1 if scalar else dimension
    hidden = 4 * dimension
    k1, k2, k3 = jax.random.split(key, 3)
    # store weights as (in, out) so kernel does x @ W
    w1 = (jax.random.normal(k1, (dimension, hidden), dtype)
          / jnp.sqrt(jnp.asarray(dimension, dtype)))
    b1 = jax.random.normal(k2, (hidden,), dtype) * 0.01
    w2 = (jax.random.normal(k3, (hidden, out_dim), dtype)
          / jnp.sqrt(jnp.asarray(hidden, dtype)))
    if biased_gates:
        b2 = jnp.full((out_dim,), gate_bias, dtype)  # gate2.bias.fill_(gate_bias)
    else:
        b2 = jnp.zeros((out_dim,), dtype)
    return w1, b1, w2, b2


def gate_apply(x, w1, b1, w2, b2, tm=256, th=512):
    """x: (..., dimension) -> (..., out_dim). Flatten leading dims, run kernel."""
    lead = x.shape[:-1]
    D = x.shape[-1]
    x2d = x.reshape(-1, D)
    out = gate_forward(x2d, w1, b1, w2, b2, tm=tm, th=th)
    return out.reshape(*lead, out.shape[-1])


def _ref(x, w1, b1, w2, b2):
    D = x.shape[-1]
    y = jnp.maximum(x.reshape(-1, D) @ w1 + b1, 0.0) @ w2 + b2
    return jax.nn.sigmoid(y).reshape(*x.shape[:-1], w2.shape[-1])


if __name__ == "__main__":
    key = jax.random.PRNGKey(0)
    kx, kp, kp2 = jax.random.split(key, 3)

    batch, seq, dimension = 2, 7, 32   # M = 14: exercises the M-remainder path
    dropout = 0.1                      # inactive at inference
    biased_gates = True
    gate_bias = 2.0

    x = jax.random.normal(kx, (batch, seq, dimension), jnp.float32)

    # vector gate (scalar=False): out dim = dimension
    w1, b1, w2, b2 = init_gate_params(kp, dimension, scalar=False,
                                      biased_gates=biased_gates,
                                      gate_bias=gate_bias)
    out = jax.block_until_ready(gate_apply(x, w1, b1, w2, b2))
    ref = _ref(x, w1, b1, w2, b2)
    assert out.shape == (batch, seq, dimension)
    assert jnp.allclose(out, ref, atol=1e-5, rtol=1e-5)

    # scalar gate (scalar=True): out dim = 1 (lane-dense padded path)
    w1s, b1s, w2s, b2s = init_gate_params(kp2, dimension, scalar=True,
                                          biased_gates=biased_gates,
                                          gate_bias=gate_bias)
    outs = jax.block_until_ready(gate_apply(x, w1s, b1s, w2s, b2s))
    refs = _ref(x, w1s, b1s, w2s, b2s)
    assert outs.shape == (batch, seq, 1)
    assert jnp.allclose(outs, refs, atol=1e-5, rtol=1e-5)

    print("KERNEL_OK")
</pallas_src>

<mosaic_0001>
module attributes {stable_mosaic.version = 11 : i64} {
  func.func @gate_kernel(%arg0: i32, %arg1: i32, %arg2: memref<16x32xf32, #tpu.memory_space<vmem>>, %arg3: memref<32x128xf32, #tpu.memory_space<vmem>>, %arg4: memref<1x128xf32, #tpu.memory_space<vmem>>, %arg5: memref<128x128xf32, #tpu.memory_space<vmem>>, %arg6: memref<1x128xf32, #tpu.memory_space<vmem>>, %arg7: memref<16x128xf32, #tpu.memory_space<vmem>>, %arg8: memref<16x128xf32, #tpu.memory_space<vmem>>) attributes {dimension_semantics = [#tpu.dimension_semantics<parallel>, #tpu.dimension_semantics<arbitrary>], iteration_bounds = array<i64: 1, 1>, scalar_prefetch = 0 : i64, scratch_operands = 1 : i64, tpu.core_type = #tpu.core_type<tc>, window_params = [{transform_indices = @transform_0, window_bounds = array<i64: 16, 32>}, {transform_indices = @transform_1, window_bounds = array<i64: 32, 128>}, {transform_indices = @transform_2, window_bounds = array<i64: 1, 128>}, {transform_indices = @transform_3, window_bounds = array<i64: 128, 128>}, {pipeline_mode = #tpu.pipeline_mode<synchronous>, transform_indices = @transform_4, window_bounds = array<i64: 1, 128>}, {transform_indices = @transform_5, window_bounds = array<i64: 16, 128>}]} {
    %c0_i32 = arith.constant 0 : i32
    %0 = arith.cmpi eq, %arg1, %c0_i32 : i32
    %1 = arith.extui %0 : i1 to i32
    %c0_i32_0 = arith.constant 0 : i32
    %2 = arith.cmpi ne, %1, %c0_i32_0 : i32
    scf.if %2 {
      %cst_16 = arith.constant 0.000000e+00 : f32
      %19 = vector.broadcast %cst_16 : f32 to vector<16x128xf32>
      %c0_17 = arith.constant 0 : index
      %c0_18 = arith.constant 0 : index
      %20 = vector.load %arg8[%c0_17, %c0_18] : memref<16x128xf32, #tpu.memory_space<vmem>>, vector<16x128xf32>
      tpu.vector_store %arg8[%c0_17, %c0_18], %19 {strides = array<i32>} : memref<16x128xf32, #tpu.memory_space<vmem>>, vector<16x128xf32>,
    } else {
    }
    %c0 = arith.constant 0 : index
    %c0_1 = arith.constant 0 : index
    %3 = vector.load %arg2[%c0, %c0_1] : memref<16x32xf32, #tpu.memory_space<vmem>>, vector<16x32xf32>
    %c0_2 = arith.constant 0 : index
    %c0_3 = arith.constant 0 : index
    %4 = vector.load %arg3[%c0_2, %c0_3] : memref<32x128xf32, #tpu.memory_space<vmem>>, vector<32x128xf32>
    %cst = arith.constant dense<0.000000e+00> : vector<16x128xf32>
    %5 = tpu.matmul %3, %4, %cst {dimension_numbers = #tpu.dot_dimension_numbers<[1], [0], [0], [1], [0, 0, 1, 1], [], []>} : vector<16x32xf32>, vector<32x128xf32>, vector<16x128xf32> -> vector<16x128xf32>
    %c0_4 = arith.constant 0 : index
    %c0_5 = arith.constant 0 : index
    %6 = vector.load %arg4[%c0_4, %c0_5] : memref<1x128xf32, #tpu.memory_space<vmem>>, vector<1x128xf32>
    %7 = vector.broadcast %6 : vector<1x128xf32> to vector<16x128xf32>
    %8 = arith.addf %5, %7 : vector<16x128xf32>
    %cst_6 = arith.constant 0.000000e+00 : f32
    %9 = vector.broadcast %cst_6 : f32 to vector<16x128xf32>
    %10 = arith.maximumf %8, %9 : vector<16x128xf32>
    %c0_7 = arith.constant 0 : index
    %c0_8 = arith.constant 0 : index
    %11 = vector.load %arg8[%c0_7, %c0_8] : memref<16x128xf32, #tpu.memory_space<vmem>>, vector<16x128xf32>
    %c0_9 = arith.constant 0 : index
    %c0_10 = arith.constant 0 : index
    %12 = vector.load %arg5[%c0_9, %c0_10] : memref<128x128xf32, #tpu.memory_space<vmem>>, vector<128x128xf32>
    %cst_11 = arith.constant dense<0.000000e+00> : vector<16x128xf32>
    %13 = tpu.matmul %10, %12, %cst_11 {dimension_numbers = #tpu.dot_dimension_numbers<[1], [0], [0], [1], [0, 0, 1, 1], [], []>} : vector<16x128xf32>, vector<128x128xf32>, vector<16x128xf32> -> vector<16x128xf32>
    %14 = arith.addf %11, %13 : vector<16x128xf32>
    %c0_12 = arith.constant 0 : index
    %c0_13 = arith.constant 0 : index
    %15 = vector.load %arg8[%c0_12, %c0_13] : memref<16x128xf32, #tpu.memory_space<vmem>>, vector<16x128xf32>
    tpu.vector_store %arg8[%c0_12, %c0_13], %14 {strides = array<i32>} : memref<16x128xf32, #tpu.memory_space<vmem>>, vector<16x128xf32>,
    %c0_i32_14 = arith.constant 0 : i32
    %16 = arith.cmpi eq, %arg1, %c0_i32_14 : i32
    %17 = arith.extui %16 : i1 to i32
    %c0_i32_15 = arith.constant 0 : i32
    %18 = arith.cmpi ne, %17, %c0_i32_15 : i32
    scf.if %18 {
      %c0_16 = arith.constant 0 : index
      %c0_17 = arith.constant 0 : index
      %19 = vector.load %arg8[%c0_16, %c0_17] : memref<16x128xf32, #tpu.memory_space<vmem>>, vector<16x128xf32>
      %c0_18 = arith.constant 0 : index
      %c0_19 = arith.constant 0 : index
      %20 = vector.load %arg6[%c0_18, %c0_19] : memref<1x128xf32, #tpu.memory_space<vmem>>, vector<1x128xf32>
      %21 = vector.broadcast %20 : vector<1x128xf32> to vector<16x128xf32>
      %22 = arith.addf %19, %21 : vector<16x128xf32>
      %23 = arith.negf %22 : vector<16x128xf32>
      %24 = math.exp %23 : vector<16x128xf32>
      %cst_20 = arith.constant 1.000000e+00 : f32
      %25 = vector.broadcast %cst_20 : f32 to vector<16x128xf32>
      %26 = arith.addf %25, %24 : vector<16x128xf32>
      %27 = arith.divf %25, %26 : vector<16x128xf32>
      %c0_21 = arith.constant 0 : index
      %c0_22 = arith.constant 0 : index
      %28 = vector.load %arg7[%c0_21, %c0_22] : memref<16x128xf32, #tpu.memory_space<vmem>>, vector<16x128xf32>
      tpu.vector_store %arg7[%c0_21, %c0_22], %27 {strides = array<i32>} : memref<16x128xf32, #tpu.memory_space<vmem>>, vector<16x128xf32>,
    } else {
    }
    return
  }
  func.func @transform_0(%arg0: i32, %arg1: i32) -> (i32, i32) {
    %c0_i32 = arith.constant 0 : i32
    %c0_i32_0 = arith.constant 0 : i32
    return %arg0, %c0_i32 : i32, i32
  }
  func.func @transform_1(%arg0: i32, %arg1: i32) -> (i32, i32) {
    %c0_i32 = arith.constant 0 : i32
    %c0_i32_0 = arith.constant 0 : i32
    return %c0_i32, %arg1 : i32, i32
  }
  func.func @transform_2(%arg0: i32, %arg1: i32) -> (i32, i32) {
    %c0_i32 = arith.constant 0 : i32
    %c0_i32_0 = arith.constant 0 : i32
    return %c0_i32, %arg1 : i32, i32
  }
  func.func @transform_3(%arg0: i32, %arg1: i32) -> (i32, i32) {
    %c0_i32 = arith.constant 0 : i32
    %c0_i32_0 = arith.constant 0 : i32
    return %arg1, %c0_i32 : i32, i32
  }
  func.func @transform_4(%arg0: i32, %arg1: i32) -> (i32, i32) {
    %c0_i32 = arith.constant 0 : i32
    %c0_i32_0 = arith.constant 0 : i32
    %c0_i32_1 = arith.constant 0 : i32
    return %c0_i32, %c0_i32_0 : i32, i32
  }
  func.func @transform_5(%arg0: i32, %arg1: i32) -> (i32, i32) {
    %c0_i32 = arith.constant 0 : i32
    %c0_i32_0 = arith.constant 0 : i32
    return %arg0, %c0_i32 : i32, i32
  }
}

</mosaic_0001>

<bundles_post_ra>
// kernel: gate_forward.1
= control target key start
LH: loop header
LB: loop body
LE: loop exit
PB: predicated region body
PF: predicated region fallthrough
CT: control target
= control target key end

     0   :  { %vm37_vm0 = vcmask 261120   ;;  %s352_s0 = inlined_call_operand.vmem [shape: f32[16,32], index: 0, kind: input, shape index: {}]   ;;  %s353_s1 = inlined_call_operand.vmem [shape: f32[32,128], index: 1, kind: input, shape index: {}]   ;;  %s354_s2 = inlined_call_operand.vmem [shape: f32[1,128], index: 2, kind: input, shape index: {}]   ;;  %s355_s3 = inlined_call_operand.vmem [shape: f32[128,128], index: 3, kind: input, shape index: {}]   ;;  %s356_s4 = inlined_call_operand.vmem [shape: f32[1,128], index: 4, kind: input, shape index: {}]   ;;  %s357_s5 = inlined_call_operand.hbm [shape: f32[16,128], index: 5, kind: output, shape index: {}]  }
   0x1   :  { %v32_v0 = vld [vmem:[%s353_s1 + $0x18] sm:$0xff]  ;;  %v31_v1 = vld [vmem:[%s353_s1 + $0x10] sm:$0xff]  ;;  %v30_v2 = vld [vmem:[%s353_s1 + $0x8] sm:$0xff] }
   0x2   :  { %56 = vmatpush.msra.mxu0 %v32_v0  ;;  %v86_v3 = vld [vmem:[%s355_s3 + $0x78] sm:$0xff]  ;;  %v85_v4 = vld [vmem:[%s355_s3 + $0x70] sm:$0xff]  ;;  %v29_v5 = vld [vmem:[%s353_s1] sm:$0xff] }
   0x3   :  { %87 = vmatpush.msra.mxu1 %v86_v3  ;;  %v84_v6 = vld [vmem:[%s355_s3 + $0x68] sm:$0xff]  ;;  %187 = vmatpush.msra.mxu2 %v86_v3  ;;  %v27_v7 = vld [vmem:[%s352_s0] sm:$0xff] }
   0x4   :  { %57 = vmatpush.msra.mxu0 %v31_v1  ;;  %v83_v8 = vld [vmem:[%s355_s3 + $0x60] sm:$0xff] }
   0x5   :  { %88 = vmatpush.msra.mxu1 %v85_v4  ;;  %188 = vmatpush.msra.mxu2 %v85_v4 }
   0x6   :  { %58 = vmatpush.msra.mxu0 %v30_v2 }
   0x7   :  { %89 = vmatpush.msra.mxu1 %v84_v6 }
   0x8   :  { %59 = vmatpush.msra.mxu0 %v29_v5 }
   0x9   :  { %10 = vsyncpa [#allocation4], 0  ;;  %183 = vmatmul.msk.f32.vlgmr.msra.gmra.mxu0 %vm37_vm0, %v27_v7  ;;  %v82_v9 = vld [vmem:[%s355_s3 + $0x58] sm:$0xff]  ;;  %189 = vmatpush.msra.mxu2 %v84_v6  ;;  %v81_v10 = vld [vmem:[%s355_s3 + $0x50] sm:$0xff]  ;;  %s171_s14 = sshll.u32 %s357_s5, 4  ;;  %s243_s15 = smov 128   ;;  %s172_s14 = int_to_ptr.hbm [resolvable:$true] %s171_s14 }
   0xa   :  { %90 = vmatpush.msra.mxu1 %v83_v8  ;;  %v80_v11 = vld [vmem:[%s355_s3 + $0x48] sm:$0xff]  ;;  %v79_v13 = vld [vmem:[%s355_s3 + $0x40] sm:$0xff]  ;;  %v78_v14 = vld [vmem:[%s355_s3 + $0x38] sm:$0xff]  ;;  %s244_s16 = smov 8  }
   0xb   :  { %190 = vmatpush.msra.mxu2 %v83_v8  ;;  %v28_v12 = vld [vmem:[%s352_s0 + $0x8] sm:$0xff]  ;;  %v77_v15 = vld [vmem:[%s355_s3 + $0x30] sm:$0xff]  ;;  %v75_v17 = vld [vmem:[%s355_s3 + $0x20] sm:$0xff] }
   0xc   :  { %91 = vmatpush.msra.mxu1 %v82_v9  ;;  %v76_v16 = vld [vmem:[%s355_s3 + $0x28] sm:$0xff]  ;;  %v74_v18 = vld [vmem:[%s355_s3 + $0x18] sm:$0xff]  ;;  %v73_v19 = vld [vmem:[%s355_s3 + $0x10] sm:$0xff] }
   0xd   :  { %191 = vmatpush.msra.mxu2 %v82_v9  ;;  %v72_v20 = vld [vmem:[%s355_s3 + $0x8] sm:$0xff]  ;;  %v71_v21 = vld [vmem:[%s355_s3] sm:$0xff] }
   0xe   :  { %92 = vmatpush.msra.mxu1 %v81_v10  ;;  %v206_v22 = vld [vmem:[%s354_s2] ss:$0 sm:$0xff]  ;;  %s242_s2 = smov [#allocation3]  }
   0xf   :  { %192 = vmatpush.msra.mxu2 %v81_v10  ;;  %v207_v29 = vld [vmem:[%s356_s4] ss:$0 sm:$0xff]  ;;  %s169_s3 = sshll.u32 %s242_s2, 4  ;;  %s170_s3 = int_to_ptr.vmem [resolvable:$true] %s169_s3 }
  0x10   :  { %93 = vmatpush.msra.mxu1 %v80_v11 }
  0x11   :  { %184 = vmatmul.msk.f32.gmra.mxu0 %vm37_vm0, %v28_v12  ;;  %193 = vmatpush.msra.mxu2 %v80_v11 }
  0x12   :  { %94 = vmatpush.msra.mxu1 %v79_v13 }
  0x13   :  { %194 = vmatpush.msra.mxu2 %v79_v13 }
  0x14   :  { %95 = vmatpush.msra.mxu1 %v78_v14 }
  0x15   :  { %195 = vmatpush.msra.mxu2 %v78_v14 }
  0x16   :  { %96 = vmatpush.msra.mxu1 %v77_v15 }
  0x17   :  { %196 = vmatpush.msra.mxu2 %v77_v15 }
  0x18   :  { %97 = vmatpush.msra.mxu1 %v76_v16 }
  0x19   :  { %197 = vmatpush.msra.mxu2 %v76_v16 }
  0x1a   :  { %98 = vmatpush.msra.mxu1 %v75_v17 }
  0x1b   :  { %198 = vmatpush.msra.mxu2 %v75_v17 }
  0x1c   :  { %99 = vmatpush.msra.mxu1 %v74_v18 }
  0x1d   :  { %199 = vmatpush.msra.mxu2 %v74_v18 }
  0x1e   :  { %100 = vmatpush.msra.mxu1 %v73_v19 }
  0x1f   :  { %200 = vmatpush.msra.mxu2 %v73_v19 }
  0x20   :  { %101 = vmatpush.msra.mxu1 %v72_v20 }
  0x21   :  { %201 = vmatpush.msra.mxu2 %v72_v20 }
  0x22   :  { %102 = vmatpush.msra.mxu1 %v71_v21 }
  0x23   :  { %202 = vmatpush.msra.mxu2 %v71_v21 }
  0x86   :  { %v61_v23 = vpop.f32.mrf.mxu0 }
  0x87   :  { %v62_v24 = vadd.f32 %v206_v22, %v61_v23 }
  0x89   :  { %v67_v25 = vmax.f32 %v62_v24, 0.0 }
  0x8b   :  { %103 = vmatmul.f32.vlgmr.msra.gmra.mxu1 %v67_v25 }
  0x8e   :  { %v64_v26 = vpop.f32.mrf.mxu0 }
  0x8f   :  { %v65_v27 = vadd.f32 %v206_v22, %v64_v26 }
  0x91   :  { %v68_v28 = vmax.f32 %v65_v27, 0.0 }
  0x93   :  { %106 = vmatmul.f32.vlgmr.msra.gmra.mxu2 %v68_v28 }
 0x108   :  { %v104_v30 = vpop.f32.mrf.mxu1 }
 0x109   :  { %v123_v31 = vadd.f32 %v207_v29, %v104_v30 }
 0x10b   :  { %v185_v32 = vmul.f32 -1.442695, %v123_v31 }
 0x10d   :  { %208 = vpow2.f32 %v185_v32 }
 0x113   :  { %v209_v33 = vpop.eup %208 }
 0x114   :  { %v131_v34 = vadd.f32 1.0, %v209_v33 }
 0x116   :  { %210 = vrcp.f32 %v131_v34  ;;  %v107_v35 = vpop.f32.mrf.mxu2  ;;  %v144_v41 = vand.u32 2147483648, %v131_v34  ;;  %v142_v44 = vand.u32 2147483647, %v131_v34  ;;  %vm138_vm2 = vweird.f32 %v131_v34 }
 0x117   :  { %v124_v36 = vadd.f32 %v207_v29, %v107_v35 }
 0x118   :  { %v145_v47 = vor.u32 1.1754944e-38, %v144_v41  ;;  %vm143_vm4 = vcmp.eq.f32.partialorder %v142_v44, 8.507059e+37 }
 0x119   :  { %v186_v37 = vmul.f32 -1.442695, %v124_v36 }
 0x11b   :  { %212 = vpow2.f32 %v186_v37 }
 0x11c   :  { %v211_v38 = vpop.eup %210 }
 0x11d   :  { %v134_v39 = vmul.f32 %v211_v38, %v131_v34  ;;  %vm139_vm1 = vweird.f32 %v211_v38 }
 0x11e   :  { %vm140_vm3 = vmor %vm138_vm2, %vm139_vm1 }
 0x11f   :  { %v135_v40 = vsub.f32 1.0, %v134_v39 }
 0x121   :  { %v213_v42 = vpop.eup %212  ;;  %v136_v43 = vmul.f32 %v211_v38, %v135_v40 }
 0x122   :  { %v132_v45 = vadd.f32 1.0, %v213_v42 }
 0x123   :  { %v137_v46 = vadd.f32 %v211_v38, %v136_v43 }
 0x124   :  { %214 = vrcp.f32 %v132_v45  ;;  %v159_v53 = vand.u32 2147483648, %v132_v45  ;;  %v157_v55 = vand.u32 2147483647, %v132_v45  ;;  %vm153_vm6 = vweird.f32 %v132_v45 }
 0x125   :  { %v141_v48 = vsel %vm140_vm3, %v211_v38, %v137_v46 }
 0x126   :  { %v146_v49 = vsel %vm143_vm4, %v145_v47, %v141_v48  ;;  %v160_v57 = vor.u32 1.1754944e-38, %v159_v53  ;;  %vm158_vm8 = vcmp.eq.f32.partialorder %v157_v55, 8.507059e+37 }
 0x127   :  { %163 = vst [vmem:[#allocation3] sm:$0xff] %v146_v49 }
 0x12a   :  { %v215_v50 = vpop.eup %214 }
 0x12b   :  { %v149_v51 = vmul.f32 %v215_v50, %v132_v45  ;;  %vm154_vm5 = vweird.f32 %v215_v50 }
 0x12c   :  { %vm155_vm7 = vmor %vm153_vm6, %vm154_vm5 }
 0x12d   :  { %v150_v52 = vsub.f32 1.0, %v149_v51 }
 0x12f   :  { %v151_v54 = vmul.f32 %v215_v50, %v150_v52 }
 0x131   :  { %v152_v56 = vadd.f32 %v215_v50, %v151_v54 }
 0x133   :  { %v156_v58 = vsel %vm155_vm7, %v215_v50, %v152_v56 }
 0x134   :  { %v161_v59 = vsel %vm158_vm8, %v160_v57, %v156_v58 }
 0x135   :  { %164 = vst [vmem:[#allocation3 + $0x8] sm:$0xff] %v161_v59 }
 0x136   :  { %177 = dma.vmem_to_hbm [thread:$0]  %s170_s3, 256, %s172_s14, [#allocation4], %s243_s15, %s243_s15, %s244_s16  }
 0x137   :  { %240 = dma.done.wait [#allocation4], 256  }
 0x138   :  { %241 = vsyncadd [#allocation4], 4294967040 }
 0x139   :  { %182 = vsyncpa [#allocation4], 1 }

</bundles_post_ra>
